<compile_context>
chip_gen: v6e
topology: v6e:2x2x1
jax: 0.10.0
libtpu: 0.0.40
codegen_flags: <defaults>
</compile_context>

<pallas_src>
import jax
import jax.numpy as jnp
from jax.experimental import pallas as pl
from jax.experimental.pallas import tpu as pltpu


def f2_kernel(x_ref, w1_ref, b1_ref, w2_ref, b2_ref, out1_ref, out2_ref):
    # x_ref / out*_ref: (C, S_TILE, 128) f32 VMEM blocks (batch dim squeezed).
    # w*_ref: (C, C) f32 in SMEM laid out (c_in, c_out).  b*_ref: (C,) in SMEM.
    C = x_ref.shape[0]

    # Hoist the 9 + 3 scalars per stage out of the unrolled FMA chains.
    w1 = [[w1_ref[ci, co] for co in range(C)] for ci in range(C)]
    b1 = [b1_ref[co] for co in range(C)]
    w2 = [[w2_ref[ci, co] for co in range(C)] for ci in range(C)]
    b2 = [b2_ref[co] for co in range(C)]

    x = [x_ref[c] for c in range(C)]                 # each a (S_TILE, 128) slab

    def conv1x1_relu(slabs, w, b):
        outs = []
        for co in range(C):
            acc = slabs[0] * w[0][co]
            for ci in range(1, C):
                acc = acc + slabs[ci] * w[ci][co]
            outs.append(jnp.maximum(acc + b[co], 0.0))   # ReLU
        return outs

    h1 = conv1x1_relu(x, w1, b1)                     # relu(conv1(x))
    for co in range(C):
        out1_ref[co] = h1[co]                        # direct full-vreg stores

    h2 = conv1x1_relu(h1, w2, b2)                    # relu(conv2(out1))
    for co in range(C):
        out2_ref[co] = h2[co]


def f2_forward(x_nchw, w1, b1, w2, b2, *, max_rows=1024):
    """x_nchw: (N, C, H, W) f32.  w*: (C, C) laid out (c_in, c_out).  b*: (C,).

    NOTE: PyTorch Conv2d weight is (c_out, c_in, 1, 1); pass w_torch[:, :, 0, 0].T
    (identical for the all-ones weights used by F2).
    """
    N, C, H, W = x_nchw.shape
    HW = H * W

    x_flat = x_nchw.reshape(N, C, HW)                # pure view, no transpose
    HW_pad = pl.cdiv(HW, 128) * 128
    padded = HW_pad != HW
    if padded:                                       # minimal pad, only if needed
        x_flat = jnp.pad(x_flat, ((0, 0), (0, 0), (0, HW_pad - HW)))

    R = HW_pad // 128                                # rows of 128 lanes
    x4 = x_flat.reshape(N, C, R, 128)                # pure view

    # Spatial tile in rows-of-128: as large as VMEM comfortably allows, but
    # split enough that N * num_tiles >= 4 so both v7x TensorCores get work.
    if R <= max_rows:
        s_tile = R                                   # full dim -> no 8-multiple needed
        if N < 4 and R >= 16:
            want = pl.cdiv(4, N)
            s = max(8, ((pl.cdiv(R, want) + 7) // 8) * 8)
            if s < R:
                s_tile = s                           # multiple of 8
    else:
        s_tile = max_rows                            # multiple of 8
    n_tiles = pl.cdiv(R, s_tile)                     # partial last block is masked
    grid = (N, n_tiles)

    blk = lambda n, j: (n, 0, j, 0)
    smem_spec = pl.BlockSpec(memory_space=pltpu.MemorySpace.SMEM)

    cost = pl.CostEstimate(
        flops=2 * C * (2 * C + 1) * N * HW,          # two VPU conv+relu stages
        transcendentals=0,
        bytes_accessed=3 * N * C * HW * 4,           # read x, write out1 + out2
    )

    out1_4, out2_4 = pl.pallas_call(
        f2_kernel,
        out_shape=(
            jax.ShapeDtypeStruct((N, C, R, 128), jnp.float32),
            jax.ShapeDtypeStruct((N, C, R, 128), jnp.float32),
        ),
        grid=grid,
        in_specs=[
            pl.BlockSpec((None, C, s_tile, 128), blk),   # x tile, batch squeezed
            smem_spec,                                   # w1 (9 scalars)
            smem_spec,                                   # b1 (3 scalars)
            smem_spec,                                   # w2
            smem_spec,                                   # b2
        ],
        out_specs=[
            pl.BlockSpec((None, C, s_tile, 128), blk),
            pl.BlockSpec((None, C, s_tile, 128), blk),
        ],
        compiler_params=pltpu.CompilerParams(
            dimension_semantics=("parallel", "parallel"),
        ),
        cost_estimate=cost,
    )(x4, w1, b1, w2, b2)

    out1 = out1_4.reshape(N, C, HW_pad)
    out2 = out2_4.reshape(N, C, HW_pad)
    if padded:
        out1 = out1[:, :, :HW]
        out2 = out2[:, :, :HW]
    return out1.reshape(N, C, H, W), out2.reshape(N, C, H, W)


if __name__ == "__main__":
    key = jax.random.PRNGKey(0)
    N, C, H, W = 2, 3, 16, 16
    x = jax.random.normal(key, (N, C, H, W), dtype=jnp.float32)

    # Parameters matching F2.__init__: 1x1 conv weights all ones, biases zero.
    # (PyTorch weight (Cout, Cin, 1, 1) -> here (Cin, Cout); identical for ones.)
    w1 = jnp.ones((C, C), dtype=jnp.float32)
    b1 = jnp.zeros((C,), dtype=jnp.float32)
    w2 = jnp.ones((C, C), dtype=jnp.float32)
    b2 = jnp.zeros((C,), dtype=jnp.float32)

    out1, out2 = f2_forward(x, w1, b1, w2, b2)
    jax.block_until_ready((out1, out2))

    # Pure-JAX reference: general 1x1 conv + bias + ReLU, applied twice.
    ref1 = jnp.maximum(
        jnp.einsum("nihw,io->nohw", x, w1) + b1[None, :, None, None], 0.0)
    ref2 = jnp.maximum(
        jnp.einsum("nihw,io->nohw", ref1, w2) + b2[None, :, None, None], 0.0)
    assert jnp.allclose(out1, ref1, atol=1e-5), "out1 mismatch"
    assert jnp.allclose(out2, ref2, atol=1e-5), "out2 mismatch"

    # Mirrors the module's prints of out1[:, 0, :, :] and out2[:, 0, :, :].
    # TODO(synk): the torch module only print()s these; we return both outputs.
    _ = out1[:, 0, :, :]
    _ = out2[:, 0, :, :]

    print("KERNEL_OK")
</pallas_src>

<mosaic_0001>
module attributes {stable_mosaic.version = 11 : i64} {
  func.func @f2_kernel(%arg0: i32, %arg1: i32, %arg2: memref<1x3x2x128xf32, #tpu.memory_space<vmem>>, %arg3: memref<3x3xf32, #tpu.memory_space<smem>>, %arg4: memref<3xf32, #tpu.memory_space<smem>>, %arg5: memref<3x3xf32, #tpu.memory_space<smem>>, %arg6: memref<3xf32, #tpu.memory_space<smem>>, %arg7: memref<1x3x2x128xf32, #tpu.memory_space<vmem>>, %arg8: memref<1x3x2x128xf32, #tpu.memory_space<vmem>>) attributes {dimension_semantics = [#tpu.dimension_semantics<parallel>, #tpu.dimension_semantics<parallel>], iteration_bounds = array<i64: 2, 1>, scalar_prefetch = 0 : i64, scratch_operands = 0 : i64, tpu.core_type = #tpu.core_type<tc>, window_params = [{transform_indices = @transform_0, window_bounds = array<i64: 1, 3, 2, 128>}, {transform_indices = @transform_1, window_bounds = array<i64: 3, 3>}, {transform_indices = @transform_2, window_bounds = array<i64: 3>}, {transform_indices = @transform_3, window_bounds = array<i64: 3, 3>}, {transform_indices = @transform_4, window_bounds = array<i64: 3>}, {transform_indices = @transform_5, window_bounds = array<i64: 1, 3, 2, 128>}, {transform_indices = @transform_6, window_bounds = array<i64: 1, 3, 2, 128>}]} {
    %c0 = arith.constant 0 : index
    %c0_0 = arith.constant 0 : index
    %0 = memref.load %arg3[%c0, %c0_0] : memref<3x3xf32, #tpu.memory_space<smem>>
    %c0_1 = arith.constant 0 : index
    %c1 = arith.constant 1 : index
    %1 = memref.load %arg3[%c0_1, %c1] : memref<3x3xf32, #tpu.memory_space<smem>>
    %c0_2 = arith.constant 0 : index
    %c2 = arith.constant 2 : index
    %2 = memref.load %arg3[%c0_2, %c2] : memref<3x3xf32, #tpu.memory_space<smem>>
    %c1_3 = arith.constant 1 : index
    %c0_4 = arith.constant 0 : index
    %3 = memref.load %arg3[%c1_3, %c0_4] : memref<3x3xf32, #tpu.memory_space<smem>>
    %c1_5 = arith.constant 1 : index
    %c1_6 = arith.constant 1 : index
    %4 = memref.load %arg3[%c1_5, %c1_6] : memref<3x3xf32, #tpu.memory_space<smem>>
    %c1_7 = arith.constant 1 : index
    %c2_8 = arith.constant 2 : index
    %5 = memref.load %arg3[%c1_7, %c2_8] : memref<3x3xf32, #tpu.memory_space<smem>>
    %c2_9 = arith.constant 2 : index
    %c0_10 = arith.constant 0 : index
    %6 = memref.load %arg3[%c2_9, %c0_10] : memref<3x3xf32, #tpu.memory_space<smem>>
    %c2_11 = arith.constant 2 : index
    %c1_12 = arith.constant 1 : index
    %7 = memref.load %arg3[%c2_11, %c1_12] : memref<3x3xf32, #tpu.memory_space<smem>>
    %c2_13 = arith.constant 2 : index
    %c2_14 = arith.constant 2 : index
    %8 = memref.load %arg3[%c2_13, %c2_14] : memref<3x3xf32, #tpu.memory_space<smem>>
    %c0_15 = arith.constant 0 : index
    %9 = memref.load %arg4[%c0_15] : memref<3xf32, #tpu.memory_space<smem>>
    %c1_16 = arith.constant 1 : index
    %10 = memref.load %arg4[%c1_16] : memref<3xf32, #tpu.memory_space<smem>>
    %c2_17 = arith.constant 2 : index
    %11 = memref.load %arg4[%c2_17] : memref<3xf32, #tpu.memory_space<smem>>
    %c0_18 = arith.constant 0 : index
    %c0_19 = arith.constant 0 : index
    %12 = memref.load %arg5[%c0_18, %c0_19] : memref<3x3xf32, #tpu.memory_space<smem>>
    %c0_20 = arith.constant 0 : index
    %c1_21 = arith.constant 1 : index
    %13 = memref.load %arg5[%c0_20, %c1_21] : memref<3x3xf32, #tpu.memory_space<smem>>
    %c0_22 = arith.constant 0 : index
    %c2_23 = arith.constant 2 : index
    %14 = memref.load %arg5[%c0_22, %c2_23] : memref<3x3xf32, #tpu.memory_space<smem>>
    %c1_24 = arith.constant 1 : index
    %c0_25 = arith.constant 0 : index
    %15 = memref.load %arg5[%c1_24, %c0_25] : memref<3x3xf32, #tpu.memory_space<smem>>
    %c1_26 = arith.constant 1 : index
    %c1_27 = arith.constant 1 : index
    %16 = memref.load %arg5[%c1_26, %c1_27] : memref<3x3xf32, #tpu.memory_space<smem>>
    %c1_28 = arith.constant 1 : index
    %c2_29 = arith.constant 2 : index
    %17 = memref.load %arg5[%c1_28, %c2_29] : memref<3x3xf32, #tpu.memory_space<smem>>
    %c2_30 = arith.constant 2 : index
    %c0_31 = arith.constant 0 : index
    %18 = memref.load %arg5[%c2_30, %c0_31] : memref<3x3xf32, #tpu.memory_space<smem>>
    %c2_32 = arith.constant 2 : index
    %c1_33 = arith.constant 1 : index
    %19 = memref.load %arg5[%c2_32, %c1_33] : memref<3x3xf32, #tpu.memory_space<smem>>
    %c2_34 = arith.constant 2 : index
    %c2_35 = arith.constant 2 : index
    %20 = memref.load %arg5[%c2_34, %c2_35] : memref<3x3xf32, #tpu.memory_space<smem>>
    %c0_36 = arith.constant 0 : index
    %21 = memref.load %arg6[%c0_36] : memref<3xf32, #tpu.memory_space<smem>>
    %c1_37 = arith.constant 1 : index
    %22 = memref.load %arg6[%c1_37] : memref<3xf32, #tpu.memory_space<smem>>
    %c2_38 = arith.constant 2 : index
    %23 = memref.load %arg6[%c2_38] : memref<3xf32, #tpu.memory_space<smem>>
    %c0_39 = arith.constant 0 : index
    %c0_40 = arith.constant 0 : index
    %c0_41 = arith.constant 0 : index
    %c0_42 = arith.constant 0 : index
    %24 = vector.load %arg2[%c0_39, %c0_40, %c0_41, %c0_42] : memref<1x3x2x128xf32, #tpu.memory_space<vmem>>, vector<1x1x2x128xf32>
    %25 = vector.shape_cast %24 : vector<1x1x2x128xf32> to vector<2x128xf32>
    %c0_43 = arith.constant 0 : index
    %c1_44 = arith.constant 1 : index
    %c0_45 = arith.constant 0 : index
    %c0_46 = arith.constant 0 : index
    %26 = vector.load %arg2[%c0_43, %c1_44, %c0_45, %c0_46] : memref<1x3x2x128xf32, #tpu.memory_space<vmem>>, vector<1x1x2x128xf32>
    %27 = vector.shape_cast %26 : vector<1x1x2x128xf32> to vector<2x128xf32>
    %c0_47 = arith.constant 0 : index
    %c2_48 = arith.constant 2 : index
    %c0_49 = arith.constant 0 : index
    %c0_50 = arith.constant 0 : index
    %28 = vector.load %arg2[%c0_47, %c2_48, %c0_49, %c0_50] : memref<1x3x2x128xf32, #tpu.memory_space<vmem>>, vector<1x1x2x128xf32>
    %29 = vector.shape_cast %28 : vector<1x1x2x128xf32> to vector<2x128xf32>
    %30 = vector.broadcast %0 : f32 to vector<2x128xf32>
    %31 = arith.mulf %25, %30 : vector<2x128xf32>
    %32 = vector.broadcast %3 : f32 to vector<2x128xf32>
    %33 = arith.mulf %27, %32 : vector<2x128xf32>
    %34 = arith.addf %31, %33 : vector<2x128xf32>
    %35 = vector.broadcast %6 : f32 to vector<2x128xf32>
    %36 = arith.mulf %29, %35 : vector<2x128xf32>
    %37 = arith.addf %34, %36 : vector<2x128xf32>
    %38 = vector.broadcast %9 : f32 to vector<2x128xf32>
    %39 = arith.addf %37, %38 : vector<2x128xf32>
    %cst = arith.constant 0.000000e+00 : f32
    %40 = vector.broadcast %cst : f32 to vector<2x128xf32>
    %41 = arith.maximumf %39, %40 : vector<2x128xf32>
    %42 = vector.broadcast %1 : f32 to vector<2x128xf32>
    %43 = arith.mulf %25, %42 : vector<2x128xf32>
    %44 = vector.broadcast %4 : f32 to vector<2x128xf32>
    %45 = arith.mulf %27, %44 : vector<2x128xf32>
    %46 = arith.addf %43, %45 : vector<2x128xf32>
    %47 = vector.broadcast %7 : f32 to vector<2x128xf32>
    %48 = arith.mulf %29, %47 : vector<2x128xf32>
    %49 = arith.addf %46, %48 : vector<2x128xf32>
    %50 = vector.broadcast %10 : f32 to vector<2x128xf32>
    %51 = arith.addf %49, %50 : vector<2x128xf32>
    %cst_51 = arith.constant 0.000000e+00 : f32
    %52 = vector.broadcast %cst_51 : f32 to vector<2x128xf32>
    %53 = arith.maximumf %51, %52 : vector<2x128xf32>
    %54 = vector.broadcast %2 : f32 to vector<2x128xf32>
    %55 = arith.mulf %25, %54 : vector<2x128xf32>
    %56 = vector.broadcast %5 : f32 to vector<2x128xf32>
    %57 = arith.mulf %27, %56 : vector<2x128xf32>
    %58 = arith.addf %55, %57 : vector<2x128xf32>
    %59 = vector.broadcast %8 : f32 to vector<2x128xf32>
    %60 = arith.mulf %29, %59 : vector<2x128xf32>
    %61 = arith.addf %58, %60 : vector<2x128xf32>
    %62 = vector.broadcast %11 : f32 to vector<2x128xf32>
    %63 = arith.addf %61, %62 : vector<2x128xf32>
    %cst_52 = arith.constant 0.000000e+00 : f32
    %64 = vector.broadcast %cst_52 : f32 to vector<2x128xf32>
    %65 = arith.maximumf %63, %64 : vector<2x128xf32>
    %c0_53 = arith.constant 0 : index
    %c0_54 = arith.constant 0 : index
    %c0_55 = arith.constant 0 : index
    %c0_56 = arith.constant 0 : index
    %66 = vector.load %arg7[%c0_53, %c0_54, %c0_55, %c0_56] : memref<1x3x2x128xf32, #tpu.memory_space<vmem>>, vector<1x1x2x128xf32>
    %67 = vector.shape_cast %66 : vector<1x1x2x128xf32> to vector<2x128xf32>
    %68 = vector.shape_cast %41 : vector<2x128xf32> to vector<1x1x2x128xf32>
    tpu.vector_store %arg7[%c0_53, %c0_54, %c0_55, %c0_56], %68 {strides = array<i32>} : memref<1x3x2x128xf32, #tpu.memory_space<vmem>>, vector<1x1x2x128xf32>,
    %c0_57 = arith.constant 0 : index
    %c1_58 = arith.constant 1 : index
    %c0_59 = arith.constant 0 : index
    %c0_60 = arith.constant 0 : index
    %69 = vector.load %arg7[%c0_57, %c1_58, %c0_59, %c0_60] : memref<1x3x2x128xf32, #tpu.memory_space<vmem>>, vector<1x1x2x128xf32>
    %70 = vector.shape_cast %69 : vector<1x1x2x128xf32> to vector<2x128xf32>
    %71 = vector.shape_cast %53 : vector<2x128xf32> to vector<1x1x2x128xf32>
    tpu.vector_store %arg7[%c0_57, %c1_58, %c0_59, %c0_60], %71 {strides = array<i32>} : memref<1x3x2x128xf32, #tpu.memory_space<vmem>>, vector<1x1x2x128xf32>,
    %c0_61 = arith.constant 0 : index
    %c2_62 = arith.constant 2 : index
    %c0_63 = arith.constant 0 : index
    %c0_64 = arith.constant 0 : index
    %72 = vector.load %arg7[%c0_61, %c2_62, %c0_63, %c0_64] : memref<1x3x2x128xf32, #tpu.memory_space<vmem>>, vector<1x1x2x128xf32>
    %73 = vector.shape_cast %72 : vector<1x1x2x128xf32> to vector<2x128xf32>
    %74 = vector.shape_cast %65 : vector<2x128xf32> to vector<1x1x2x128xf32>
    tpu.vector_store %arg7[%c0_61, %c2_62, %c0_63, %c0_64], %74 {strides = array<i32>} : memref<1x3x2x128xf32, #tpu.memory_space<vmem>>, vector<1x1x2x128xf32>,
    %75 = vector.broadcast %12 : f32 to vector<2x128xf32>
    %76 = arith.mulf %41, %75 : vector<2x128xf32>
    %77 = vector.broadcast %15 : f32 to vector<2x128xf32>
    %78 = arith.mulf %53, %77 : vector<2x128xf32>
    %79 = arith.addf %76, %78 : vector<2x128xf32>
    %80 = vector.broadcast %18 : f32 to vector<2x128xf32>
    %81 = arith.mulf %65, %80 : vector<2x128xf32>
    %82 = arith.addf %79, %81 : vector<2x128xf32>
    %83 = vector.broadcast %21 : f32 to vector<2x128xf32>
    %84 = arith.addf %82, %83 : vector<2x128xf32>
    %cst_65 = arith.constant 0.000000e+00 : f32
    %85 = vector.broadcast %cst_65 : f32 to vector<2x128xf32>
    %86 = arith.maximumf %84, %85 : vector<2x128xf32>
    %87 = vector.broadcast %13 : f32 to vector<2x128xf32>
    %88 = arith.mulf %41, %87 : vector<2x128xf32>
    %89 = vector.broadcast %16 : f32 to vector<2x128xf32>
    %90 = arith.mulf %53, %89 : vector<2x128xf32>
    %91 = arith.addf %88, %90 : vector<2x128xf32>
    %92 = vector.broadcast %19 : f32 to vector<2x128xf32>
    %93 = arith.mulf %65, %92 : vector<2x128xf32>
    %94 = arith.addf %91, %93 : vector<2x128xf32>
    %95 = vector.broadcast %22 : f32 to vector<2x128xf32>
    %96 = arith.addf %94, %95 : vector<2x128xf32>
    %cst_66 = arith.constant 0.000000e+00 : f32
    %97 = vector.broadcast %cst_66 : f32 to vector<2x128xf32>
    %98 = arith.maximumf %96, %97 : vector<2x128xf32>
    %99 = vector.broadcast %14 : f32 to vector<2x128xf32>
    %100 = arith.mulf %41, %99 : vector<2x128xf32>
    %101 = vector.broadcast %17 : f32 to vector<2x128xf32>
    %102 = arith.mulf %53, %101 : vector<2x128xf32>
    %103 = arith.addf %100, %102 : vector<2x128xf32>
    %104 = vector.broadcast %20 : f32 to vector<2x128xf32>
    %105 = arith.mulf %65, %104 : vector<2x128xf32>
    %106 = arith.addf %103, %105 : vector<2x128xf32>
    %107 = vector.broadcast %23 : f32 to vector<2x128xf32>
    %108 = arith.addf %106, %107 : vector<2x128xf32>
    %cst_67 = arith.constant 0.000000e+00 : f32
    %109 = vector.broadcast %cst_67 : f32 to vector<2x128xf32>
    %110 = arith.maximumf %108, %109 : vector<2x128xf32>
    %c0_68 = arith.constant 0 : index
    %c0_69 = arith.constant 0 : index
    %c0_70 = arith.constant 0 : index
    %c0_71 = arith.constant 0 : index
    %111 = vector.load %arg8[%c0_68, %c0_69, %c0_70, %c0_71] : memref<1x3x2x128xf32, #tpu.memory_space<vmem>>, vector<1x1x2x128xf32>
    %112 = vector.shape_cast %111 : vector<1x1x2x128xf32> to vector<2x128xf32>
    %113 = vector.shape_cast %86 : vector<2x128xf32> to vector<1x1x2x128xf32>
    tpu.vector_store %arg8[%c0_68, %c0_69, %c0_70, %c0_71], %113 {strides = array<i32>} : memref<1x3x2x128xf32, #tpu.memory_space<vmem>>, vector<1x1x2x128xf32>,
    %c0_72 = arith.constant 0 : index
    %c1_73 = arith.constant 1 : index
    %c0_74 = arith.constant 0 : index
    %c0_75 = arith.constant 0 : index
    %114 = vector.load %arg8[%c0_72, %c1_73, %c0_74, %c0_75] : memref<1x3x2x128xf32, #tpu.memory_space<vmem>>, vector<1x1x2x128xf32>
    %115 = vector.shape_cast %114 : vector<1x1x2x128xf32> to vector<2x128xf32>
    %116 = vector.shape_cast %98 : vector<2x128xf32> to vector<1x1x2x128xf32>
    tpu.vector_store %arg8[%c0_72, %c1_73, %c0_74, %c0_75], %116 {strides = array<i32>} : memref<1x3x2x128xf32, #tpu.memory_space<vmem>>, vector<1x1x2x128xf32>,
    %c0_76 = arith.constant 0 : index
    %c2_77 = arith.constant 2 : index
    %c0_78 = arith.constant 0 : index
    %c0_79 = arith.constant 0 : index
    %117 = vector.load %arg8[%c0_76, %c2_77, %c0_78, %c0_79] : memref<1x3x2x128xf32, #tpu.memory_space<vmem>>, vector<1x1x2x128xf32>
    %118 = vector.shape_cast %117 : vector<1x1x2x128xf32> to vector<2x128xf32>
    %119 = vector.shape_cast %110 : vector<2x128xf32> to vector<1x1x2x128xf32>
    tpu.vector_store %arg8[%c0_76, %c2_77, %c0_78, %c0_79], %119 {strides = array<i32>} : memref<1x3x2x128xf32, #tpu.memory_space<vmem>>, vector<1x1x2x128xf32>,
    return
  }
  func.func @transform_0(%arg0: i32, %arg1: i32) -> (i32, i32, i32, i32) {
    %c0_i32 = arith.constant 0 : i32
    %c0_i32_0 = arith.constant 0 : i32
    %c0_i32_1 = arith.constant 0 : i32
    return %arg0, %c0_i32, %arg1, %c0_i32_0 : i32, i32, i32, i32
  }
  func.func @transform_1(%arg0: i32, %arg1: i32) -> (i32, i32) {
    %c0_i32 = arith.constant 0 : i32
    %c0_i32_0 = arith.constant 0 : i32
    %c0_i32_1 = arith.constant 0 : i32
    return %c0_i32, %c0_i32_0 : i32, i32
  }
  func.func @transform_2(%arg0: i32, %arg1: i32) -> i32 {
    %c0_i32 = arith.constant 0 : i32
    %c0_i32_0 = arith.constant 0 : i32
    return %c0_i32 : i32
  }
  func.func @transform_3(%arg0: i32, %arg1: i32) -> (i32, i32) {
    %c0_i32 = arith.constant 0 : i32
    %c0_i32_0 = arith.constant 0 : i32
    %c0_i32_1 = arith.constant 0 : i32
    return %c0_i32, %c0_i32_0 : i32, i32
  }
  func.func @transform_4(%arg0: i32, %arg1: i32) -> i32 {
    %c0_i32 = arith.constant 0 : i32
    %c0_i32_0 = arith.constant 0 : i32
    return %c0_i32 : i32
  }
  func.func @transform_5(%arg0: i32, %arg1: i32) -> (i32, i32, i32, i32) {
    %c0_i32 = arith.constant 0 : i32
    %c0_i32_0 = arith.constant 0 : i32
    %c0_i32_1 = arith.constant 0 : i32
    return %arg0, %c0_i32, %arg1, %c0_i32_0 : i32, i32, i32, i32
  }
  func.func @transform_6(%arg0: i32, %arg1: i32) -> (i32, i32, i32, i32) {
    %c0_i32 = arith.constant 0 : i32
    %c0_i32_0 = arith.constant 0 : i32
    %c0_i32_1 = arith.constant 0 : i32
    return %arg0, %c0_i32, %arg1, %c0_i32_0 : i32, i32, i32, i32
  }
}

</mosaic_0001>

<bundles_post_ra>
// kernel: tpu_custom_call.1
= control target key start
LH: loop header
LB: loop body
LE: loop exit
PB: predicated region body
PF: predicated region fallthrough
CT: control target
= control target key end

     0   :  { %s1346_s0 = inlined_call_operand.hbm [shape: f32[2,3,2,128], index: 0, kind: input, shape index: {}]   ;;  %s1347_s1 = inlined_call_operand.hbm [shape: f32[3,3], index: 1, kind: input, shape index: {}]   ;;  %s1348_s2 = inlined_call_operand.vmem [shape: f32[3], index: 2, kind: input, shape index: {}]   ;;  %s1349_s3 = inlined_call_operand.vmem [shape: f32[3,3], index: 3, kind: input, shape index: {}]   ;;  %s1350_s4 = inlined_call_operand.vmem [shape: f32[3], index: 4, kind: input, shape index: {}]   ;;  %s1351_s5 = inlined_call_operand.hbm [shape: f32[2,3,2,128], index: 5, kind: output, shape index: {0}]   ;;  %s1352_s6 = inlined_call_operand.hbm [shape: f32[2,3,2,128], index: 6, kind: output, shape index: {1}]  }
   0x1   :  { %1357 = sst [smem:[#allocation21_spill]] %s1347_s1 }
   0x2   :  { %1358 = sst [smem:[#allocation22_spill]] %s1348_s2 }
   0x3   :  { %1359 = sst [smem:[#allocation23_spill]] %s1349_s3 }
   0x4   :  { %12 = vsyncpa [#allocation3], 0 }
   0x5   :  { %14 = vsyncpa [#allocation3 + $0x1], 0 }
   0x6   :  { %15 = vsyncpa [#allocation5], 0 }
   0x7   :  { %16 = vsyncpa [#allocation6], 0 }
   0x8   :  { %17 = vsyncpa [#allocation10], 0 }
   0x9   :  { %18 = vsyncpa [#allocation4], 0 }
   0xa   :  { %20 = vsyncpa [#allocation4 + $0x1], 0 }
   0xb   :  { %21 = vsyncpa [#allocation14], 0 }
   0xc   :  { %23 = vsyncpa [#allocation14 + $0x1], 0  ;;  %s1069_s21 = smov 0   ;;  %s1071_s22 = smov 0  }
   0xd   :  { %s1073_s23 = smov 0   ;;  %s1075_s24 = smov 0  }
   0xe   :  { %s1077_s25 = smov 0   ;;  %s1079_s26 = smov 0  }
   0xf LB: > { %s654_s27 = sadd.s32 4294967295, %s1021_s26   ;;  %s655_s28 = sadd.s32 4294967294, %s1021_s26   ;;  %s1021_s26 = sphi %s1079_s26, %s29_s26   ;;  %s1017_s25 = sphi %s1077_s25, %s1381_s25   ;;  %s1013_s24 = sphi %s1075_s24, %s1380_s24   ;;  %s1009_s23 = sphi %s1073_s23, %s1379_s23   ;;  %s1005_s22 = sphi %s1071_s22, %s1378_s22   ;;  %s1001_s21 = sphi %s1069_s21, %s1377_s21  }
  0x10   : > { %p63_p0 = scmp.ne.s32.totalorder %s1005_s22, %s1001_s21  ;;  %p1103_p1 = scmp.eq.s32.totalorder %s654_s27, 0 }
  0x11   : > { %p1107_p2 = scmp.eq.s32.totalorder %s654_s27, 1  ;;  %p179_p3 = scmp.eq.s32.totalorder %s655_s28, 1 }
  0x12   : > { %s1360_s29 = scalar_select %p1103_p1, 1, 0 }
  0x13   : > { %s1361_s30 = scalar_select %p1107_p2, 1, 0 }
  0x14   : > { %p1113_p4 = por %p1103_p1, %p63_p0  ;;  %p656_p5 = scmp.ge.s32.totalorder %s1021_s26, 1 }
  0x15   : > { %p1118_p6 = por %p179_p3, %p63_p0  ;;  %p214_p7 = scmp.lt.s32.totalorder %s1021_s26, 3 }
  0x16   : > { %s1362_s7 = scalar_select %p1113_p4, 1, 0 }
  0x17   : > { %s1363_s8 = scalar_select %p1118_p6, 1, 0 }
  0x18   : > { %s1364_s3 = sld [smem:[#allocation23_spill]]  ;;  %p1126_p8 = pnand %p656_p5, %p214_p7 }
  0x19   : > { %s1367_s2 = sld [smem:[#allocation22_spill]]  ;;  %s258_s19 = sshll.u32 %s1350_s4, 4  ;;  %s259_s19 = int_to_ptr.vmem [resolvable:$true] %s258_s19 }
  0x1a   : > { %s1365_s12 = scalar_select %p1126_p8, 1, 0 }
  0x1b   : > { %p725_p10 = pneg %p1126_p8 }
  0x1d   : > { %p1135_p11 = pnand %p725_p10, %p1103_p1 }
  0x1e   : > { %s247_s11 = sshll.u32 %s1364_s3, 4  ;;  %s248_s11 = int_to_ptr.vmem [resolvable:$true] %s247_s11 }
  0x1f   : > { %s236_s16 = sshll.u32 %s1367_s2, 4  ;;  %s815_s20 = scalar_lea.vmem %s248_s11, 64  ;;  %s237_s16 = int_to_ptr.vmem [resolvable:$true] %s236_s16 }
  0x20   : > { %p816_p12 = scmp.ne.s32.totalorder %s248_s11, %s815_s20  ;;  %p817_p13 = pneg %p1135_p11 }
  0x21   : > { %p823_p5 = scmp.lt.s32.totalorder %s248_s11, %s248_s11  ;;  %p824_p7 = scmp.lt.s32.totalorder %s815_s20, %s815_s20 }
  0x22   : > { %p818_p0 = pnand %p817_p13, %p816_p12 }
  0x23   : > { %p825_p10 = por %p824_p7, %p823_p5 }
  0x24   : > { %p819_p3 = pneg %p818_p0 }
  0x26   : > { %p826_p9 = pnand %p825_p10, %p819_p3 }
  0x28   : > { %829 = shalt.err (!%p826_p9)
}
  0x29   : > { %s1023_s27 = smov [#allocation9]   ;;  %s1024_s28 = smov [#allocation7]  }
  0x2a   : > { %734 = dma.vmem_to_smem (!%p1135_p11), %s248_s11, 64, %s1023_s27, [#allocation10]  }
  0x2b   : > { %s1368_s1 = sld [smem:[#allocation21_spill]]  ;;  %s841_s14 = scalar_lea.vmem %s237_s16, 16 }
  0x2c   : > { %p842_p12 = scmp.ne.s32.totalorder %s237_s16, %s841_s14  ;;  %p849_p3 = scmp.lt.s32.totalorder %s237_s16, %s237_s16 }
  0x2d   : > { %p850_p9 = scmp.lt.s32.totalorder %s841_s14, %s841_s14 }
  0x2e   : > { %p844_p0 = pnand %p842_p12, %p817_p13 }
  0x2f   : > { %p851_p7 = por %p850_p9, %p849_p3 }
  0x30   : > { %p845_p5 = pneg %p844_p0 }
  0x31   : > { %728 = dma.hbm_to_smem (!%p1135_p11), %s1368_s1, 64, %s1024_s28, [#allocation5]  }
  0x32   : > { %p852_p10 = pnand %p851_p7, %p845_p5 }
  0x34   : > { %855 = shalt.err (!%p852_p10)
}
  0x35   : > { %s1025_s15 = smov [#allocation8]   ;;  %s856_s11 = scalar_lea.vmem %s259_s19, 16 }
  0x36   : > { %731 = dma.vmem_to_smem (!%p1135_p11), %s237_s16, 16, %s1025_s15, [#allocation6]  }
  0x37   : > { %p857_p6 = scmp.ne.s32.totalorder %s259_s19, %s856_s11  ;;  %p864_p8 = scmp.lt.s32.totalorder %s259_s19, %s259_s19 }
  0x38   : > { %p865_p12 = scmp.lt.s32.totalorder %s856_s11, %s856_s11 }
  0x39   : > { %p859_p1 = pnand %p857_p6, %p817_p13 }
  0x3a   : > { %p866_p0 = por %p865_p12, %p864_p8 }
  0x3b   : > { %p860_p4 = pneg %p859_p1 }
  0x3d   : > { %p867_p2 = pnand %p866_p0, %p860_p4 }
  0x3f   : > { %870 = shalt.err (!%p867_p2)
}
  0x40   : > { %s1026_s17 = smov [#allocation11]   ;;  %s41_s16 = sadd.s32 1, %s1017_s25 }
  0x41   : > { %737 = dma.vmem_to_smem (!%p1135_p11), %s259_s19, 16, %s1026_s17, [#allocation10]  }
  0x42   : > { %s50_s18 = sadd.s32 1, %s1009_s23  ;;  %p43_p1 = scmp.ge.s32.totalorder %s41_s16, 2 }
  0x43   : > { %p57_p4 = scmp.ne.s32.totalorder %s1009_s23, %s1005_s22  ;;  %p58_p2 = scmp.eq.s32.totalorder %s1021_s26, 0 }
  0x44   : > { %p753_p6 = scmp.lt.s32.totalorder %s1021_s26, 2  ;;  %s1383_s16 = smov (%p43_p1, %s41_s16), 0 }
  0x45   : > { %p59_p8 = por %p58_p2, %p57_p4  ;;  %p1369_p13 = scmp.ne.s32.totalorder %s1361_s30, 0 }
  0x46   : > { %s45_s20 = ssub.s32 %s1017_s25, %s1383_s16  ;;  %s269_s27 = sand.u32 1, %s1009_s23  }
  0x47   : > { %p1177_p5 = por %p1369_p13, %p57_p4  ;;  %p48_p3 = scmp.eq.s32.totalorder %s45_s20, 0 }
  0x48   : > { %s698_s19 = smul.u32 6, %s269_s27  ;;  %p1184_p11 = pnand %p753_p6, %p59_p8 }
  0x49   : > { %s1189_s9 = scalar_select %p48_p3, %s1009_s23, %s50_s18  }
  0x4a   : > { %s699_s10 = smul.u32 96, %s1017_s25  ;;  %s273_s14 = scalar_lea.vmem [#allocation2], %s698_s19 }
  0x4b   : > { %s281_s15 = sshll.u32 %s273_s14, 4  ;;  %s270_s1 = scalar_lea.sflag [#allocation3], %s269_s27  ;;  %s282_s15 = int_to_ptr.vmem [resolvable:$true] %s281_s15 }
  0x4c   : > { %s280_s17 = scalar_lea.hbm %s1346_s0, %s699_s10  ;;  %p873_p9 = pneg %p1184_p11 }
  0x4d   : > { %s884_s20 = scalar_lea.vmem %s282_s15, 96  ;;  %s1027_s2 = smov [#allocation2]  }
  0x4e   : > { %p885_p7 = scmp.ne.s32.totalorder %s282_s15, %s884_s20  ;;  %s889_s3 = sshll.u32 %s1027_s2, 4  ;;  %s890_s3 = int_to_ptr.vmem [resolvable:$false] %s889_s3 }
  0x4f   : > { %s891_s18 = scalar_lea.vmem %s890_s3, 192  ;;  %p892_p0 = scmp.lt.s32.totalorder %s282_s15, %s890_s3 }
  0x50   : > { %p887_p10 = pnand %p885_p7, %p873_p9  ;;  %p893_p1 = scmp.lt.s32.totalorder %s891_s18, %s884_s20 }
  0x52   : > { %p888_p12 = pneg %p887_p10  ;;  %p894_p4 = por %p893_p1, %p892_p0 }
  0x54   : > { %p895_p2 = pnand %p894_p4, %p888_p12 }
  0x56   : > { %898 = shalt.err (!%p895_p2)
}
  0x57   : > { %s1028_s19 = smov 32   ;;  %s1029_s10 = smov 2  }
  0x58   : > { %741 = dma.hbm_to_vmem [thread:$0]  (!%p1184_p11), %s280_s17, 96, %s282_s15, %s270_s1, %s1028_s19, %s1028_s19, %s1029_s10  }
  0x59   : > { %p1372_p6 = scmp.ne.s32.totalorder %s1365_s12, 0 }
  0x5a   : > { %s1202_s27 = sand.u32 (!%p1372_p6), 1, %s1005_s22   ;;  %p1373_p8 = scmp.ne.s32.totalorder (!%p1372_p6), %s1362_s7, 0 }
  0x5b   : > { %293 = sbr.rel (%p1372_p6) target bundleno = 176 (0xb0), region = 40  ;;  %s296_s3 = scalar_lea.sflag (!%p1372_p6), [#allocation3], %s1202_s27 }
  0x5c   : > { %s1205_s2 = smul.u32 (!%p1372_p6), 6, %s1202_s27 }
  0x5e   : > { %s299_s14 = scalar_lea.vmem (!%p1372_p6), [#allocation2], %s1205_s2 }
  0x60   : > { %976 = dma.done.wait (%p1373_p8), %s296_s3, 96  }
  0x61   : > { %978 = vsyncadd (%p1373_p8), %s296_s3, 4294967200  ;;  %p1374_p13 = scmp.ne.s32.totalorder %s1360_s29, 0 }
  0x63   : > { %980 = dma.done.wait (%p1374_p13), [#allocation5], 64  }
  0x64   : > { %982 = vsyncadd (%p1374_p13), [#allocation5], 4294967232 }
  0x65   : > { %984 = dma.done.wait (%p1374_p13), [#allocation6], 16  }
  0x66   : > { %986 = vsyncadd (%p1374_p13), [#allocation6], 4294967280 }
  0x67   : > { %988 = dma.done.wait (%p1374_p13), [#allocation10], 80  }
  0x68   : > { %990 = vsyncadd (%p1374_p13), [#allocation10], 4294967216 }
  0x69   : > { %320 = sfence }
  0x6a   : > { %s350_s1 = sld [smem:[#allocation7]]  ;;  %v374_v0 = vld [vmem:[%s299_s14] sm:$0x3]  ;;  %v688_v1 = vld [vmem:[%s299_s14 + $0x2] sm:$0x3] }
  0x6b   : > { %s670_s7 = sld [smem:[#allocation7 + $0x80]]  ;;  %v689_v2 = vld [vmem:[%s299_s14 + $0x4] sm:$0x3] }
  0x6c   : > { %s673_s12 = sld [smem:[#allocation7 + $0x100]] }
  0x6d   : > { %s359_s28 = sld [smem:[#allocation8]] }
  0x6e   : > { %s668_s15 = sld [smem:[#allocation7 + $0x1]] }
  0x6f   : > { %s671_s11 = sld [smem:[#allocation7 + $0x81]] }
  0x70   : > { %v379_v3 = vstv %s350_s1  ;;  %s674_s30 = sld [smem:[#allocation7 + $0x101]] }
  0x71   : > { %v380_v4 = vmul.f32 %v379_v3, %v374_v0  ;;  %v381_v5 = vstv %s670_s7  ;;  %s1225_s17 = sld [smem:[#allocation8 + $0x1]] }
  0x72   : > { %v382_v6 = vmul.f32 %v688_v1, %v381_v5  ;;  %v384_v7 = vstv %s673_s12  ;;  %s669_s29 = sld [smem:[#allocation7 + $0x2]] }
  0x73   : > { %v385_v8 = vmul.f32 %v689_v2, %v384_v7  ;;  %s672_s20 = sld [smem:[#allocation7 + $0x82]]  ;;  %v387_v11 = vstv %s359_s28  ;;  %s1237_s28 = scalar_lea.vmem [#allocation12], %s1205_s2 }
  0x74   : > { %v383_v9 = vadd.f32 %v382_v6, %v380_v4  ;;  %v390_v10 = vstv %s668_s15  ;;  %s675_s18 = sld [smem:[#allocation7 + $0x102]] }
  0x75   : > { %v391_v12 = vmul.f32 %v390_v10, %v374_v0  ;;  %v392_v13 = vstv %s671_s11  ;;  %s1227_s19 = sld [smem:[#allocation8 + $0x2]] }
  0x76   : > { %v386_v14 = vadd.f32 %v385_v8, %v383_v9  ;;  %v393_v15 = vmul.f32 %v688_v1, %v392_v13  ;;  %v395_v16 = vstv %s674_s30  ;;  %s362_s10 = sld [smem:[#allocation9]] }
  0x77   : > { %v396_v17 = vmul.f32 %v689_v2, %v395_v16  ;;  %s1229_s3 = sld [smem:[#allocation9 + $0x80]]  ;;  %v398_v21 = vstv %s1225_s17 }
  0x78   : > { %v388_v18 = vadd.f32 %v387_v11, %v386_v14  ;;  %v394_v19 = vadd.f32 %v393_v15, %v391_v12  ;;  %v401_v20 = vstv %s669_s29  ;;  %s1231_s14 = sld [smem:[#allocation9 + $0x100]]  ;;  %s475_s29 = sshll.u32 %s1237_s28, 4  ;;  %s1250_s29 = int_to_ptr.vmem [resolvable:$true] %s475_s29 }
  0x79   : > { %v402_v22 = vmul.f32 %v401_v20, %v374_v0  ;;  %v403_v23 = vstv %s672_s20  ;;  %s1234_s1 = sld [smem:[#allocation11]] }
  0x7a   : > { %v389_v24 = vmax.f32 %v388_v18, 0.0  ;;  %v397_v25 = vadd.f32 %v396_v17, %v394_v19  ;;  %v404_v26 = vmul.f32 %v688_v1, %v403_v23  ;;  %v406_v27 = vstv %s675_s18  ;;  %s678_s7 = sld [smem:[#allocation9 + $0x1]] }
  0x7b   : > { %v407_v28 = vmul.f32 %v689_v2, %v406_v27  ;;  %s681_s12 = sld [smem:[#allocation9 + $0x81]]  ;;  %v409_v32 = vstv %s1227_s19  ;;  %s701_s19 = smul.u32 96, %s1013_s24 }
  0x7c   : > { %412 = vst [vmem:[%s1237_s28] sm:$0x3] %v389_v24  ;;  %v399_v29 = vadd.f32 %v398_v21, %v397_v25  ;;  %v405_v30 = vadd.f32 %v404_v26, %v402_v22  ;;  %v417_v31 = vstv %s362_s10  ;;  %s684_s15 = sld [smem:[#allocation9 + $0x101]] }
  0x7d   : > { %v419_v33 = vstv %s1229_s3  ;;  %s1242_s11 = sld [smem:[#allocation11 + $0x1]]  ;;  %v418_v36 = vmul.f32 %v417_v31, %v389_v24 }
  0x7e   : > { %v400_v34 = vmax.f32 %v399_v29, 0.0  ;;  %v408_v35 = vadd.f32 %v407_v28, %v405_v30  ;;  %s679_s30 = sld [smem:[#allocation9 + $0x2]]  ;;  %v422_v40 = vstv %s1231_s14  ;;  %s1260_s14 = scalar_lea.hbm %s1351_s5, %s701_s19 }
  0x7f   : > { %s682_s17 = sld [smem:[#allocation9 + $0x82]]  ;;  %v425_v51 = vstv %s1234_s1  ;;  %s456_s1 = scalar_lea.sflag [#allocation4], %s1202_s27 }
  0x80   : > { %690 = vst [vmem:[%s1237_s28 + $0x2] sm:$0x3] %v400_v34  ;;  %v410_v37 = vadd.f32 %v409_v32, %v408_v35  ;;  %v420_v38 = vmul.f32 %v419_v33, %v400_v34  ;;  %v428_v39 = vstv %s678_s7  ;;  %s685_s20 = sld [smem:[#allocation9 + $0x102]]  ;;  %s899_s7 = scalar_lea.vmem %s1250_s29, 96 }
  0x81   : > { %v429_v41 = vmul.f32 %v428_v39, %v389_v24  ;;  %v430_v42 = vstv %s681_s12  ;;  %s1247_s18 = sld [smem:[#allocation11 + $0x2]]  ;;  %p900_p3 = scmp.ne.s32.totalorder %s1250_s29, %s899_s7 }
  0x82   : > { %v411_v43 = vmax.f32 %v410_v37, 0.0  ;;  %v421_v44 = vadd.f32 %v420_v38, %v418_v36  ;;  %v431_v45 = vmul.f32 %v430_v42, %v400_v34  ;;  %v433_v46 = vstv %s684_s15  ;;  %s1030_s12 = smov [#allocation12]  }
  0x83   : > { %v436_v52 = vstv %s1242_s11  ;;  %p901_p11 = pnand %p900_p3, %p1177_p5 }
  0x84   : > { %691 = vst [vmem:[%s1237_s28 + $0x4] sm:$0x3] %v411_v43  ;;  %v423_v47 = vmul.f32 %v422_v40, %v411_v43  ;;  %v432_v48 = vadd.f32 %v431_v45, %v429_v41  ;;  %v434_v49 = vmul.f32 %v433_v46, %v411_v43  ;;  %v439_v50 = vstv %s679_s30  ;;  %s903_s28 = sshll.u32 %s1030_s12, 4  ;;  %s904_s28 = int_to_ptr.vmem [resolvable:$false] %s903_s28 }
  0x85   : > { %v440_v53 = vmul.f32 %v439_v50, %v389_v24  ;;  %v441_v54 = vstv %s682_s17  ;;  %p902_p9 = pneg %p901_p11  ;;  %s905_s15 = scalar_lea.vmem %s904_s28, 192 }
  0x86   : > { %v424_v55 = vadd.f32 %v423_v47, %v421_v44  ;;  %v435_v56 = vadd.f32 %v434_v49, %v432_v48  ;;  %v442_v57 = vmul.f32 %v441_v54, %v400_v34  ;;  %v444_v58 = vstv %s685_s20  ;;  %p906_p7 = scmp.lt.s32.totalorder %s1250_s29, %s904_s28  ;;  %p907_p10 = scmp.lt.s32.totalorder %s905_s15, %s899_s7 }
  0x87   : > { %v445_v59 = vmul.f32 %v444_v58, %v411_v43 }
  0x88   : > { %v426_v60 = vadd.f32 %v425_v51, %v424_v55  ;;  %v437_v61 = vadd.f32 %v436_v52, %v435_v56  ;;  %v443_v62 = vadd.f32 %v442_v57, %v440_v53  ;;  %p908_p12 = por %p907_p10, %p906_p7 }
  0x8a   : > { %p909_p0 = pnand %p908_p12, %p902_p9 }
  0x8c   : > { %912 = shalt.err (!%p909_p0)
}
  0x8d   : > { %s913_s11 = scalar_lea.hbm %s1260_s14, 96  ;;  %s917_s20 = scalar_lea.hbm %s1351_s5, 192 }
  0x8e   : > { %p914_p1 = scmp.ne.s32.totalorder %s1260_s14, %s913_s11  ;;  %p918_p6 = scmp.lt.s32.totalorder %s1260_s14, %s1351_s5 }
  0x8f   : > { %p919_p8 = scmp.lt.s32.totalorder %s917_s20, %s913_s11 }
  0x90   : > { %p915_p4 = pnand %p914_p1, %p1177_p5 }
  0x91   : > { %p920_p13 = por %p919_p8, %p918_p6 }
  0x92   : > { %p916_p2 = pneg %p915_p4 }
  0x94   : > { %p921_p3 = pnand %p920_p13, %p916_p2 }
  0x96   : > { %924 = shalt.err (!%p921_p3)
}
  0x97   : > { %s1031_s7 = smov 32   ;;  %s1032_s12 = smov 2   ;;  %v447_v63 = vstv %s1247_s18  ;;  %v427_v0 = vmax.f32 %v426_v60, 0.0  ;;  %v438_v1 = vmax.f32 %v437_v61, 0.0  ;;  %v446_v2 = vadd.f32 %v445_v59, %v443_v62 }
  0x98   : > { %721 = dma.vmem_to_hbm [thread:$0]  (%p1177_p5), %s1250_s29, 96, %s1260_s14, %s456_s1, %s1031_s7, %s1031_s7, %s1032_s12  }
  0x99   : > { %s349_s28 = scalar_lea.vmem [#allocation13], %s1205_s2  ;;  %v448_v3 = vadd.f32 %v447_v63, %v446_v2  ;;  %s1297_s29 = scalar_lea.hbm %s1352_s6, %s701_s19 }
  0x9a   : > { %s492_s15 = sshll.u32 %s349_s28, 4  ;;  %450 = vst [vmem:[%s349_s28] sm:$0x3] %v427_v0  ;;  %692 = vst [vmem:[%s349_s28 + $0x2] sm:$0x3] %v438_v1  ;;  %s461_s2 = scalar_lea.sflag [#allocation14], %s1202_s27  ;;  %s1290_s15 = int_to_ptr.vmem [resolvable:$true] %s492_s15 }
  0x9b   : > { %v449_v4 = vmax.f32 %v448_v3, 0.0  ;;  %s925_s18 = scalar_lea.vmem %s1290_s15, 96  ;;  %s1033_s14 = smov [#allocation13]  }
  0x9c   : > { %p926_p11 = scmp.ne.s32.totalorder %s1290_s15, %s925_s18  ;;  %s929_s1 = sshll.u32 %s1033_s14, 4  ;;  %s930_s1 = int_to_ptr.vmem [resolvable:$false] %s929_s1 }
  0x9d   : > { %693 = vst [vmem:[%s349_s28 + $0x4] sm:$0x3] %v449_v4  ;;  %s931_s17 = scalar_lea.vmem %s930_s1, 192  ;;  %p932_p10 = scmp.lt.s32.totalorder %s1290_s15, %s930_s1 }
  0x9e   : > { %p927_p9 = pnand %p926_p11, %p1177_p5  ;;  %p933_p12 = scmp.lt.s32.totalorder %s931_s17, %s925_s18 }
  0xa0   : > { %p928_p7 = pneg %p927_p9  ;;  %p934_p0 = por %p933_p12, %p932_p10 }
  0xa2   : > { %p935_p1 = pnand %p934_p0, %p928_p7 }
  0xa4   : > { %938 = shalt.err (!%p935_p1)
}
  0xa5   : > { %s939_s24 = scalar_lea.hbm %s1297_s29, 96  ;;  %s943_s20 = scalar_lea.hbm %s1352_s6, 192 }
  0xa6   : > { %p940_p4 = scmp.ne.s32.totalorder %s1297_s29, %s939_s24  ;;  %p944_p8 = scmp.lt.s32.totalorder %s1297_s29, %s1352_s6 }
  0xa7   : > { %p945_p13 = scmp.lt.s32.totalorder %s943_s20, %s939_s24 }
  0xa8   : > { %p941_p2 = pnand %p940_p4, %p1177_p5 }
  0xa9   : > { %p946_p3 = por %p945_p13, %p944_p8 }
  0xaa   : > { %p942_p6 = pneg %p941_p2 }
  0xac   : > { %p947_p11 = pnand %p946_p3, %p942_p6 }
  0xae   : > { %950 = shalt.err (!%p947_p11)
}
  0xaf   : > { %722 = dma.vmem_to_hbm [thread:$0]  (%p1177_p5), %s1290_s15, 96, %s1297_s29, %s461_s2, %s1031_s7, %s1031_s7, %s1032_s12  }
  0xb0 PF: > { %s507_s28 = sand.u32 1, %s1001_s21   ;;  %p1375_p9 = scmp.ne.s32.totalorder %s1363_s8, 0 }
  0xb1   : > { %p1376_p7 = scmp.ge.s32.totalorder %s1021_s26, 2  ;;  %s508_s11 = scalar_lea.sflag [#allocation4], %s507_s28 }
  0xb3   : > { %p743_p10 = pnand %p1376_p7, %p1375_p9 }
  0xb5   : > { %p744_p12 = pneg %p743_p10 }
  0xb7   : > { %992 = dma.done.wait (%p744_p12), %s508_s11, 96  }
  0xb8   : > { %994 = vsyncadd (%p744_p12), %s508_s11, 4294967200  ;;  %s517_s30 = scalar_lea.sflag [#allocation14], %s507_s28 }
  0xb9   : > { %996 = dma.done.wait (%p744_p12), %s517_s30, 96  }
  0xba   : > { %998 = vsyncadd (%p744_p12), %s517_s30, 4294967200  ;;  %s29_s26 = sadd.s32 1, %s1021_s26   ;;  %s1377_s21 = smov %s1005_s22 }
  0xbb   : > { %p26_p0 = scmp.ge.s32.totalorder %s29_s26, 4   ;;  %s1378_s22 = smov %s1009_s23 }
  0xbc   : > { %s1379_s23 = smov %s1189_s9  ;;  %s1380_s24 = smov %s1017_s25 }
  0xbd   : > { %s1381_s25 = smov %s1383_s16  ;;  %28 = sbr.rel (!%p26_p0) target bundleno = 15 (0xf), region = 126 }
  0xc2   :  { %522 = vsyncpa [#allocation3], 1 }
  0xc3   :  { %524 = vsyncpa [#allocation3 + $0x1], 1 }
  0xc4   :  { %525 = vsyncpa [#allocation4], 1 }
  0xc5   :  { %527 = vsyncpa [#allocation4 + $0x1], 1 }
  0xc6   :  { %528 = vsyncpa [#allocation14], 1 }
  0xc7   :  { %530 = vsyncpa [#allocation14 + $0x1], 1 }
  0xc8   :  { %531 = vsyncpa [#allocation5], 1 }
  0xc9   :  { %533 = vsyncpa [#allocation5 + $0x1], 1 }
  0xca   :  { %534 = vsyncpa [#allocation6], 1 }
  0xcb   :  { %536 = vsyncpa [#allocation6 + $0x1], 1 }
  0xcc   :  { %537 = vsyncpa [#allocation10], 1 }

</bundles_post_ra>
